<compile_context>
chip_gen: v7x
topology: tpu7x:2x2x1
jax: 0.10.0
libtpu: 0.0.40
codegen_flags: <defaults>
</compile_context>

<pallas_src>
import math
import functools

import jax
import jax.numpy as jnp
from jax.experimental import pallas as pl
from jax.experimental.pallas import tpu as pltpu  # noqa: F401  (kept for TPU-specific tuning hooks)


def _sdpa_dropout_kernel(q_ref, k_ref, v_ref, bits_ref, o_ref, *,
                         scale, dropout_p):
    # Whole-problem view: refs are (B, S, D) / (B, S, S); single grid step.
    q = q_ref[...].astype(jnp.float32)
    k = k_ref[...].astype(jnp.float32)
    v = v_ref[...].astype(jnp.float32)

    # Apply the scale to q (B*S*D elements) instead of the B*S*S logits,
    # and skip it entirely when it is the identity (dim == 1 case).
    if scale != 1.0:
        q = q * jnp.float32(scale)

    # qk = q @ k^T, batched, contracting on the shared last (lane) dim —
    # no explicit transpose.
    s = jnp.einsum('bqd,bkd->bqk', q, k, preferred_element_type=jnp.float32)

    # Numerically stable softmax pieces (normalization folded below).
    m = jnp.max(s, axis=-1, keepdims=True)
    e = jnp.exp(s - m)
    l = jnp.sum(e, axis=-1, keepdims=True)

    if dropout_p > 0.0:
        # Dropout: raw uint32 bits vs. precomputed threshold -> keep mask.
        # Keep probability = (2^32 - threshold) / 2^32 = 1 - p.
        threshold = jnp.uint32(int(round(dropout_p * (2.0 ** 32))))
        keep = bits_ref[...] >= threshold
        # Fold the softmax normalization and the 1/(1-p) keep-scale together.
        inv = jnp.float32(1.0 / (1.0 - dropout_p)) / l
        p_mat = jnp.where(keep, e * inv, jnp.float32(0.0))
    else:
        p_mat = e / l

    o_ref[...] = jnp.einsum('bqk,bkd->bqd', p_mat, v,
                            preferred_element_type=jnp.float32).astype(o_ref.dtype)


def sdpa_dropout(query, key, value, *, dim=1, dropout_p=0.2, seed=0):
    """Matches Model.forward: softmax(Q K^T / sqrt(dim)) -> dropout(p) -> @ V."""
    B, S, D = query.shape
    scale = 1.0 / math.sqrt(dim)
    out_dtype = query.dtype

    # Trace-time special case: p == 1 drops everything (torch returns zeros).
    if dropout_p >= 1.0:
        return jnp.zeros((B, S, D), out_dtype)

    # Dropout randomness generated on the host side of the pallas_call
    # (uint32 bits); the kernel only does a threshold compare.
    bits = jax.random.bits(jax.random.PRNGKey(seed), (B, S, S), dtype=jnp.uint32)

    kernel = functools.partial(_sdpa_dropout_kernel,
                               scale=scale, dropout_p=float(dropout_p))

    # No grid: the whole problem lives in VMEM for one invocation
    # (B=2, S=8, D=32 -> a few KB), so per-step grid/DMA overhead is gone.
    return pl.pallas_call(
        kernel,
        out_shape=jax.ShapeDtypeStruct((B, S, D), out_dtype),
    )(query, key, value, bits)


if __name__ == "__main__":
    # Shapes consistent with the module: batch=2, seq=8, head_dim=32.
    # Module globals: dim=1, heads=1 -> scale_factor = 1/sqrt(1) = 1.0
    B, S, D = 2, 8, 32
    k0 = jax.random.PRNGKey(0)
    kq, kk, kv = jax.random.split(k0, 3)
    query = jax.random.normal(kq, (B, S, D), dtype=jnp.float32)
    key_ = jax.random.normal(kk, (B, S, D), dtype=jnp.float32)
    value = jax.random.normal(kv, (B, S, D), dtype=jnp.float32)

    out = sdpa_dropout(query, key_, value, dim=1, dropout_p=0.2, seed=1234)
    jax.block_until_ready(out)

    assert out.shape == (B, S, D)
    assert out.dtype == query.dtype
    assert jnp.all(jnp.isfinite(out))
    print("KERNEL_OK")
</pallas_src>

<mosaic_0001>
module attributes {stable_mosaic.version = 11 : i64} {
  func.func @_sdpa_dropout_kernel(%arg0: memref<2x8x32xf32, #tpu.memory_space<vmem>>, %arg1: memref<2x8x32xf32, #tpu.memory_space<vmem>>, %arg2: memref<2x8x32xf32, #tpu.memory_space<vmem>>, %arg3: memref<2x8x8xi32, #tpu.memory_space<vmem>>, %arg4: memref<2x8x32xf32, #tpu.memory_space<vmem>>) attributes {dimension_semantics = [], scalar_prefetch = 0 : i64, scratch_operands = 0 : i64, tpu.core_type = #tpu.core_type<tc>} {
    %c0 = arith.constant 0 : index
    %c0_0 = arith.constant 0 : index
    %c0_1 = arith.constant 0 : index
    %0 = vector.load %arg0[%c0, %c0_0, %c0_1] : memref<2x8x32xf32, #tpu.memory_space<vmem>>, vector<2x8x32xf32>
    %c0_2 = arith.constant 0 : index
    %c0_3 = arith.constant 0 : index
    %c0_4 = arith.constant 0 : index
    %1 = vector.load %arg1[%c0_2, %c0_3, %c0_4] : memref<2x8x32xf32, #tpu.memory_space<vmem>>, vector<2x8x32xf32>
    %c0_5 = arith.constant 0 : index
    %c0_6 = arith.constant 0 : index
    %c0_7 = arith.constant 0 : index
    %2 = vector.load %arg2[%c0_5, %c0_6, %c0_7] : memref<2x8x32xf32, #tpu.memory_space<vmem>>, vector<2x8x32xf32>
    "tpu.trace_start"() <{level = 10 : i32, message = "bqd,bkd->bqk"}> : () -> ()
    %cst = arith.constant dense<0.000000e+00> : vector<2x8x8xf32>
    %3 = tpu.matmul %0, %1, %cst {dimension_numbers = #tpu.dot_dimension_numbers<[2], [2], [1], [1], [0, 0, 0, 1, 1, 1], [0], [0]>} : vector<2x8x32xf32>, vector<2x8x32xf32>, vector<2x8x8xf32> -> vector<2x8x8xf32>
    "tpu.trace_stop"() : () -> ()
    %cst_8 = arith.constant dense<0xFF800000> : vector<2x8xf32>
    %4 = vector.multi_reduction <maximumf>, %3, %cst_8 [2] : vector<2x8x8xf32> to vector<2x8xf32>
    %5 = vector.shape_cast %4 : vector<2x8xf32> to vector<2x8x1xf32>
    %6 = vector.broadcast %5 : vector<2x8x1xf32> to vector<2x8x8xf32>
    %7 = arith.subf %3, %6 : vector<2x8x8xf32>
    %8 = math.exp %7 : vector<2x8x8xf32>
    %cst_9 = arith.constant dense<0.000000e+00> : vector<2x8xf32>
    %9 = vector.multi_reduction <add>, %8, %cst_9 [2] : vector<2x8x8xf32> to vector<2x8xf32>
    %10 = vector.shape_cast %9 : vector<2x8xf32> to vector<2x8x1xf32>
    %c0_10 = arith.constant 0 : index
    %c0_11 = arith.constant 0 : index
    %c0_12 = arith.constant 0 : index
    %11 = vector.load %arg3[%c0_10, %c0_11, %c0_12] : memref<2x8x8xi32, #tpu.memory_space<vmem>>, vector<2x8x8xi32>
    %c858993459_i32 = arith.constant 858993459 : i32
    %12 = vector.broadcast %c858993459_i32 : i32 to vector<2x8x8xi32>
    %13 = arith.cmpi uge, %11, %12 : vector<2x8x8xi32>
    %cst_13 = arith.constant 1.250000e+00 : f32
    %14 = vector.broadcast %cst_13 : f32 to vector<2x8x1xf32>
    %15 = arith.divf %14, %10 : vector<2x8x1xf32>
    %16 = vector.broadcast %15 : vector<2x8x1xf32> to vector<2x8x8xf32>
    %17 = arith.mulf %8, %16 : vector<2x8x8xf32>
    %cst_14 = arith.constant 0.000000e+00 : f32
    %18 = vector.broadcast %cst_14 : f32 to vector<2x8x8xf32>
    %19 = arith.select %13, %17, %18 : vector<2x8x8xi1>, vector<2x8x8xf32>
    "tpu.trace_start"() <{level = 10 : i32, message = "bqk,bkd->bqd"}> : () -> ()
    %cst_15 = arith.constant dense<0.000000e+00> : vector<2x8x32xf32>
    %20 = tpu.matmul %19, %2, %cst_15 {dimension_numbers = #tpu.dot_dimension_numbers<[2], [1], [1], [2], [0, 0, 0, 1, 1, 2], [0], [0]>} : vector<2x8x8xf32>, vector<2x8x32xf32>, vector<2x8x32xf32> -> vector<2x8x32xf32>
    "tpu.trace_stop"() : () -> ()
    %c0_16 = arith.constant 0 : index
    %c0_17 = arith.constant 0 : index
    %c0_18 = arith.constant 0 : index
    %21 = vector.load %arg4[%c0_16, %c0_17, %c0_18] : memref<2x8x32xf32, #tpu.memory_space<vmem>>, vector<2x8x32xf32>
    tpu.vector_store %arg4[%c0_16, %c0_17, %c0_18], %20 {strides = array<i32>} : memref<2x8x32xf32, #tpu.memory_space<vmem>>, vector<2x8x32xf32>,
    return
  }
}

</mosaic_0001>

<bundles_post_ra>
// kernel: tpu_custom_call.1
= control target key start
LH: loop header
LB: loop body
LE: loop exit
PB: predicated region body
PF: predicated region fallthrough
CT: control target
= control target key end

     0   :  { %9 = vsyncpa [#allocation3], 0  ;;  %s738_s0 = inlined_call_operand.hbm [shape: f32[2,8,32], index: 0, kind: input, shape index: {}]   ;;  %s739_s1 = inlined_call_operand.hbm [shape: f32[2,8,32], index: 1, kind: input, shape index: {}]   ;;  %s740_s2 = inlined_call_operand.hbm [shape: f32[2,8,32], index: 2, kind: input, shape index: {}]   ;;  %s741_s3 = inlined_call_operand.hbm [shape: u32[2,8,8], index: 3, kind: input, shape index: {}]   ;;  %s742_s4 = inlined_call_operand.hbm [shape: f32[2,8,32], index: 4, kind: output, shape index: {}]  }
   0x1   :  { %10 = vsyncpa [#allocation6], 0 }
   0x2   :  { %11 = vsyncpa [#allocation9], 0 }
   0x3   :  { %12 = vsyncpa [#allocation4], 0  ;;  %s599_s15 = smov [#allocation5]   ;;  %s600_s17 = smov [#allocation2]  }
   0x4   :  { %s30_s16 = sshll.u32 %s599_s15, 4  ;;  %s18_s18 = sshll.u32 %s600_s17, 4  ;;  %s31_s16 = int_to_ptr.vmem [resolvable:$true] %s30_s16  ;;  %s633_s18 = int_to_ptr.vmem [resolvable:$true] %s18_s18 }
   0x5   :  { %s481_s21 = scalar_lea.hbm %s739_s1, 256 }
   0x6   :  { %p482_p0 = scmp.ne.s32.totalorder %s739_s1, %s481_s21  ;;  %p485_p1 = scmp.lt.u32.totalorder %s481_s21, %s739_s1 }
   0x8   :  { %p487_p2 = pnand %p485_p1, %p482_p0 }
   0xa   :  { %490 = shalt.err (!%p487_p2)
}
   0xb   :  { %s491_s26 = scalar_lea.vmem %s31_s16, 256  ;;  %p496_p4 = scmp.lt.s32.totalorder %s31_s16, %s31_s16 }
   0xc   :  { %p492_p3 = scmp.ne.s32.totalorder %s31_s16, %s491_s26  ;;  %p497_p5 = scmp.lt.s32.totalorder %s491_s26, %s491_s26 }
   0xe   :  { %p498_p6 = por %p497_p5, %p496_p4 }
  0x10   :  { %p499_p7 = pnand %p498_p6, %p492_p3 }
  0x12   :  { %502 = shalt.err (!%p499_p7)
}
  0x13   :  { %s601_s27 = smov 128   ;;  %s602_s28 = smov 8  }
  0x14   :  { %36 = dma.hbm_to_vmem [thread:$0]  %s739_s1, 256, %s31_s16, [#allocation6], %s601_s27, %s601_s27, %s602_s28  }
  0x15   :  { %s503_s7 = scalar_lea.hbm %s738_s0, 256 }
  0x16   :  { %p504_p8 = scmp.ne.s32.totalorder %s738_s0, %s503_s7  ;;  %p507_p9 = scmp.lt.u32.totalorder %s503_s7, %s738_s0 }
  0x18   :  { %p509_p10 = pnand %p507_p9, %p504_p8 }
  0x1a   :  { %512 = shalt.err (!%p509_p10)
}
  0x1b   :  { %s513_s12 = scalar_lea.vmem %s633_s18, 256  ;;  %p518_p12 = scmp.lt.s32.totalorder %s633_s18, %s633_s18 }
  0x1c   :  { %p514_p11 = scmp.ne.s32.totalorder %s633_s18, %s513_s12  ;;  %p519_p13 = scmp.lt.s32.totalorder %s513_s12, %s513_s12 }
  0x1e   :  { %p520_p0 = por %p519_p13, %p518_p12 }
  0x20   :  { %p521_p1 = pnand %p520_p0, %p514_p11 }
  0x22   :  { %524 = shalt.err (!%p521_p1)
}
  0x23   :  { %24 = dma.hbm_to_vmem [thread:$0]  %s738_s0, 256, %s633_s18, [#allocation3], %s601_s27, %s601_s27, %s602_s28  }
  0x24   :  { %s603_s14 = smov [#allocation7]   ;;  %s604_s16 = smov [#allocation8]  }
  0x25   :  { %s42_s15 = sshll.u32 %s603_s14, 4  ;;  %s54_s17 = sshll.u32 %s604_s16, 4  ;;  %s43_s15 = int_to_ptr.vmem [resolvable:$true] %s42_s15  ;;  %s670_s17 = int_to_ptr.vmem [resolvable:$true] %s54_s17 }
  0x26   :  { %s525_s21 = scalar_lea.hbm %s740_s2, 256 }
  0x27   :  { %p526_p2 = scmp.ne.s32.totalorder %s740_s2, %s525_s21  ;;  %p529_p3 = scmp.lt.u32.totalorder %s525_s21, %s740_s2 }
  0x29   :  { %p531_p4 = pnand %p529_p3, %p526_p2 }
  0x2b   :  { %534 = shalt.err (!%p531_p4)
}
  0x2c   :  { %s535_s0 = scalar_lea.vmem %s43_s15, 256  ;;  %p540_p6 = scmp.lt.s32.totalorder %s43_s15, %s43_s15 }
  0x2d   :  { %p536_p5 = scmp.ne.s32.totalorder %s43_s15, %s535_s0  ;;  %p541_p7 = scmp.lt.s32.totalorder %s535_s0, %s535_s0 }
  0x2f   :  { %p542_p8 = por %p541_p7, %p540_p6 }
  0x31   :  { %p543_p9 = pnand %p542_p8, %p536_p5 }
  0x33   :  { %546 = shalt.err (!%p543_p9)
}
  0x34   :  { %48 = dma.hbm_to_vmem [thread:$0]  %s740_s2, 256, %s43_s15, [#allocation6], %s601_s27, %s601_s27, %s602_s28  }
  0x35   :  { %s547_s5 = scalar_lea.hbm %s741_s3, 256 }
  0x36   :  { %p548_p10 = scmp.ne.s32.totalorder %s741_s3, %s547_s5  ;;  %p551_p11 = scmp.lt.u32.totalorder %s547_s5, %s741_s3 }
  0x38   :  { %p553_p12 = pnand %p551_p11, %p548_p10 }
  0x3a   :  { %556 = shalt.err (!%p553_p12)
}
  0x3b   :  { %s557_s10 = scalar_lea.vmem %s670_s17, 256  ;;  %p562_p0 = scmp.lt.s32.totalorder %s670_s17, %s670_s17 }
  0x3c   :  { %p558_p13 = scmp.ne.s32.totalorder %s670_s17, %s557_s10  ;;  %p563_p1 = scmp.lt.s32.totalorder %s557_s10, %s557_s10 }
  0x3e   :  { %p564_p2 = por %p563_p1, %p562_p0 }
  0x40   :  { %p565_p3 = pnand %p564_p2, %p558_p13 }
  0x42   :  { %568 = shalt.err (!%p565_p3)
}
  0x43   :  { %60 = dma.hbm_to_vmem [thread:$0]  %s741_s3, 256, %s670_s17, [#allocation9], %s601_s27, %s601_s27, %s602_s28  }
  0x44   :  { %591 = dma.done.wait [#allocation3], 256  }
  0x45   :  { %592 = vsyncadd [#allocation3], 4294967040 }
  0x46   :  { %593 = dma.done.wait [#allocation6], 512  }
  0x47   :  { %594 = vsyncadd [#allocation6], 4294966784 }
  0x48   :  { %595 = dma.done.wait [#allocation9], 256  }
  0x49   :  { %596 = vsyncadd [#allocation9], 4294967040  ;;  %v605_v0 = vmov 0.0   ;;  %vm606_vm0 = vmmov 0   ;;  %vm79_vm1 = vcmask 261120   ;;  %v75_v1 = vld [vmem:[#allocation5] sm:$0xff] }
  0x4a   :  { %444 = vmatprep.subr.mxu0 %v605_v0  ;;  %446 = vmatprep.mubr.msk.f32.mxu0 %vm606_vm0, %v605_v0  ;;  %v76_v2 = vld [vmem:[#allocation5 + $0x8] sm:$0xff]  ;;  %v73_v3 = vld [vmem:[#allocation2] sm:$0xff]  ;;  %v74_v4 = vld [vmem:[#allocation2 + $0x8] sm:$0xff]  ;;  %vm232_vm2 = vcmask 64512   ;;  %s607_s3 = smov [#allocation10]  }
  0x4b   :  { %449 = vmatprep.subr.mxu1 %v605_v0  ;;  %451 = vmatprep.mubr.msk.f32.mxu1 %vm606_vm0, %v605_v0  ;;  %v77_v21 = vld [vmem:[#allocation7] sm:$0xff]  ;;  %v78_v22 = vld [vmem:[#allocation7 + $0x8] sm:$0xff]  ;;  %v251_v25 = vld [vmem:[#allocation8] sm:$0xff]  ;;  %s416_s12 = sshll.u32 %s607_s3, 4  ;;  %s417_s12 = int_to_ptr.vmem [resolvable:$true] %s416_s12 }
  0x4c   :  { %445 = vmatpush3.xpose.msk.msra.mxu0 %vm79_vm1, %v75_v1  ;;  %450 = vmatpush3.xpose.msk.msra.mxu1 %vm79_vm1, %v76_v2  ;;  %vm253_vm3 = vcmp.ge.u32.totalorder %v251_v25, 858993459  ;;  %v252_v29 = vld [vmem:[#allocation8 + $0x8] sm:$0xff]  ;;  %s569_s1 = scalar_lea.vmem %s417_s12, 256  ;;  %p574_p5 = scmp.lt.s32.totalorder %s417_s12, %s417_s12 }
  0x4d   :  { %454 = vmatprep.subr.mxu0 %v605_v0  ;;  %459 = vmatprep.subr.mxu1 %v605_v0  ;;  %vm254_vm4 = vcmp.ge.u32.totalorder %v252_v29, 858993459  ;;  %p570_p4 = scmp.ne.s32.totalorder %s417_s12, %s569_s1  ;;  %p575_p6 = scmp.lt.s32.totalorder %s569_s1, %s569_s1 }
  0x4f   :  { %447 = vmatmul.mubr.msk.f32.vlgmr.msra.gmra.mrb[0].mxu0 %vm79_vm1, %v73_v3  ;;  %452 = vmatmul.mubr.msk.f32.vlgmr.msra.gmra.mrb[0].mxu1 %vm79_vm1, %v74_v4  ;;  %p576_p7 = por %p575_p6, %p574_p5 }
  0x50   :  { %456 = vmatprep.mubr.msk.f32.mxu0 %vm606_vm0, %v605_v0  ;;  %461 = vmatprep.mubr.msk.f32.mxu1 %vm606_vm0, %v605_v0 }
  0x51   :  { %455 = vmatpush3.msra.mxu0 %v77_v21  ;;  %460 = vmatpush3.msra.mxu1 %v78_v22  ;;  %p577_p8 = pnand %p576_p7, %p570_p4 }
 0x122   :  { %v152_v5 = vpop.f32.mrb[0].mxu0  ;;  %v228_v6 = vpop.f32.mrb[0].mxu1 }
 0x123   :  { %v448_v7 = vpop.f32.mrb[1].mxu0  ;;  %v233_v8 = vsel %vm232_vm2, %v152_v5, -inf  ;;  %v453_v9 = vpop.f32.mrb[1].mxu1  ;;  %v236_v10 = vsel %vm232_vm2, %v228_v6, -inf }
 0x124   :  { %234 = vmax.xlane.f32.xlu0 %v233_v8 }
 0x128   :  { %237 = vmax.xlane.f32.xlu0 %v236_v10 }
 0x1b1   :  { %v235_v11 = vpop.xlane.xlu0 %234 }
 0x1b2   :  { %v239_v12 = vsub.f32 %v152_v5, %v235_v11 }
 0x1b4   :  { %v241_v13 = vmul.f32 1.442695, %v239_v12 }
 0x1b5   :  { %v238_v14 = vpop.xlane.xlu0 %237 }
 0x1b6   :  { %473 = vpow2.f32 %v241_v13  ;;  %v240_v15 = vsub.f32 %v228_v6, %v238_v14 }
 0x1b8   :  { %v243_v16 = vmul.f32 1.442695, %v240_v15 }
 0x1ba   :  { %475 = vpow2.f32 %v243_v16 }
 0x1c0   :  { %v474_v17 = vpop.eup %473 }
 0x1c1   :  { %v245_v18 = vsel %vm232_vm2, %v474_v17, 0.0 }
 0x1c2   :  { %246 = vadd.xlane.f32.xlu1 %v245_v18 }
 0x1c4   :  { %v476_v19 = vpop.eup %475 }
 0x1c5   :  { %v248_v20 = vsel %vm232_vm2, %v476_v19, 0.0 }
 0x1c6   :  { %249 = vadd.xlane.f32.xlu1 %v248_v20 }
 0x24f   :  { %v247_v23 = vpop.xlane.xlu1 %246 }
 0x250   :  { %477 = vrcp.f32 %v247_v23 }
 0x253   :  { %v250_v24 = vpop.xlane.xlu1 %249 }
 0x254   :  { %479 = vrcp.f32 %v250_v24 }
 0x25a   :  { %v478_v26 = vpop.eup %477 }
 0x25b   :  { %v256_v27 = vmul.f32 1.25, %v478_v26 }
 0x25d   :  { %v259_v28 = vmul.f32 %v474_v17, %v256_v27 }
 0x25e   :  { %v480_v30 = vpop.eup %479 }
 0x25f   :  { %v258_v31 = vmul.f32 1.25, %v480_v30  ;;  %v261_v32 = vsel %vm253_vm3, %v259_v28, 0.0 }
 0x260   :  { %457 = vmatmul.mubr.msk.f32.vlgmr.msra.gmra.mrb[2].mxu0 %vm232_vm2, %v261_v32 }
 0x261   :  { %v260_v33 = vmul.f32 %v476_v19, %v258_v31 }
 0x263   :  { %v262_v34 = vsel %vm254_vm4, %v260_v33, 0.0 }
 0x264   :  { %462 = vmatmul.mubr.msk.f32.vlgmr.msra.gmra.mrb[2].mxu1 %vm232_vm2, %v262_v34 }
 0x333   :  { %v332_v35 = vpop.f32.mrb[2].mxu0 }
 0x334   :  { %409 = vst.msk [vmem:[#allocation10] sm:$0xff] %vm79_vm1, %v332_v35  ;;  %v458_v36 = vpop.f32.mrb[3].mxu0 }
 0x337   :  { %v405_v37 = vpop.f32.mrb[2].mxu1 }
 0x338   :  { %410 = vst.msk [vmem:[#allocation10 + $0x8] sm:$0xff] %vm79_vm1, %v405_v37  ;;  %v463_v38 = vpop.f32.mrb[3].mxu1 }
 0x339   :  { %580 = shalt.err (!%p577_p8)
}
 0x33a   :  { %s581_s15 = scalar_lea.hbm %s742_s4, 256 }
 0x33b   :  { %p582_p9 = scmp.ne.s32.totalorder %s742_s4, %s581_s15  ;;  %p585_p10 = scmp.lt.u32.totalorder %s581_s15, %s742_s4 }
 0x33d   :  { %p587_p11 = pnand %p585_p10, %p582_p9 }
 0x33f   :  { %590 = shalt.err (!%p587_p11)
}
 0x340   :  { %422 = dma.vmem_to_hbm [thread:$0]  %s417_s12, 256, %s742_s4, [#allocation4], %s601_s27, %s601_s27, %s602_s28  }
 0x341   :  { %597 = dma.done.wait [#allocation4], 256  }
 0x342   :  { %598 = vsyncadd [#allocation4], 4294967040 }
 0x343   :  { %426 = vsyncpa [#allocation3], 1 }
 0x344   :  { %427 = vsyncpa [#allocation6], 1 }
 0x345   :  { %428 = vsyncpa [#allocation9], 1 }
 0x346   :  { %429 = vsyncpa [#allocation4], 1 }

</bundles_post_ra>
